<compile_context>
chip_gen: v7x
topology: tpu7x:2x2x1
jax: 0.10.0
libtpu: 0.0.40
codegen_flags: <defaults>
</compile_context>

<pallas_src>
import jax
import jax.numpy as jnp
from jax.experimental import pallas as pl
from jax.experimental.pallas import tpu as pltpu

IN_F = 11
HID_F = 16


def _mlp_kernel(x_ref, w1_ref, b1_ref, w2_ref, b2_ref, o_ref):
    x = x_ref[...]                                            # [TB, 11] native layout
    # Layer 1 on the MXU: [TB,11] @ [11,16] -> [TB,16], f32 accumulation.
    h = jnp.dot(x, w1_ref[...], preferred_element_type=jnp.float32)
    h = jnp.maximum(h + b1_ref[...], 0.0)                     # bias + ReLU on the VPU
    # Layer 2 as a second tiny MXU dot: [TB,16] @ [16,1] -> [TB,1].
    y = jnp.dot(h, w2_ref[...], preferred_element_type=jnp.float32) + b2_ref[...]
    o_ref[...] = y.astype(o_ref.dtype)


def _pick_tb(B, tb_max):
    """Pick the batch tile: big enough to amortize per-step overhead, >=2 tiles
    for v7x megacore when the batch is large, always 8-row aligned (or == B)."""
    if B > tb_max:
        return tb_max
    if B >= 4096 and B % 16 == 0:
        return B // 2          # two "parallel" grid steps -> both v7x TensorCores
    return B                   # single full-batch block (block dim == array dim)


def mlp_forward(x, w1, b1, w2, b2, *, tb_max=8192):
    """x: [B, 11]; w1: [16, 11]; b1: [16]; w2: [1, 16]; b2: [1] -> [B, 1]."""
    B = x.shape[0]
    tb = _pick_tb(B, tb_max)
    n_tiles = pl.cdiv(B, tb)

    # Tiny parameter reshapes only (176 / 16 / 16 / 1 elements) — negligible.
    xk = jnp.asarray(x, jnp.float32)                       # [B, 11], streamed as-is
    w1t = jnp.asarray(w1, jnp.float32).T                   # [11, 16]
    b1r = jnp.asarray(b1, jnp.float32).reshape(1, HID_F)   # [1, 16]
    w2t = jnp.asarray(w2, jnp.float32).reshape(HID_F, 1)   # [16, 1]
    b2r = jnp.asarray(b2, jnp.float32).reshape(1, 1)       # [1, 1]

    out = pl.pallas_call(
        _mlp_kernel,
        out_shape=jax.ShapeDtypeStruct((B, 1), jnp.float32),
        grid=(n_tiles,),
        in_specs=[
            pl.BlockSpec((tb, IN_F), lambda i: (i, 0)),      # streamed x tile
            pl.BlockSpec((IN_F, HID_F), lambda i: (0, 0)),   # resident weights
            pl.BlockSpec((1, HID_F), lambda i: (0, 0)),
            pl.BlockSpec((HID_F, 1), lambda i: (0, 0)),
            pl.BlockSpec((1, 1), lambda i: (0, 0)),
        ],
        out_specs=pl.BlockSpec((tb, 1), lambda i: (i, 0)),
        compiler_params=pltpu.CompilerParams(
            dimension_semantics=("parallel",),
            vmem_limit_bytes=48 * 1024 * 1024,   # within v7x's 64 MiB physical VMEM
        ),
        cost_estimate=pl.CostEstimate(
            flops=2 * B * (IN_F * HID_F + HID_F),
            transcendentals=0,
            bytes_accessed=4 * (B * (IN_F + 1) + IN_F * HID_F + 2 * HID_F + 1),
        ),
    )(xk, w1t, b1r, w2t, b2r)

    return out  # [B, 1]


def init_params(key):
    """Deterministic init mimicking torch.nn.Linear defaults, torch layout."""
    k1, k2, k3, k4 = jax.random.split(key, 4)
    bound1 = 1.0 / jnp.sqrt(float(IN_F))
    bound2 = 1.0 / jnp.sqrt(float(HID_F))
    w1 = jax.random.uniform(k1, (HID_F, IN_F), jnp.float32, -bound1, bound1)  # [out, in]
    b1 = jax.random.uniform(k2, (HID_F,), jnp.float32, -bound1, bound1)
    w2 = jax.random.uniform(k3, (1, HID_F), jnp.float32, -bound2, bound2)
    b2 = jax.random.uniform(k4, (1,), jnp.float32, -bound2, bound2)
    return w1, b1, w2, b2


def _ref(x, w1, b1, w2, b2):
    # Pure-JAX reference (torch semantics: x @ W1^T + b1 -> ReLU -> @ W2^T + b2).
    return jnp.maximum(x @ w1.T + b1, 0.0) @ w2.T + b2


if __name__ == "__main__":
    key = jax.random.PRNGKey(0)
    kx, kx2, kp = jax.random.split(key, 3)
    w1, b1, w2, b2 = init_params(kp)

    # Small smoke test (B = 8).
    B = 8
    x = jax.random.normal(kx, (B, IN_F), jnp.float32)
    out = jax.block_until_ready(mlp_forward(x, w1, b1, w2, b2))
    assert out.shape == (B, 1)
    assert jnp.allclose(out, _ref(x, w1, b1, w2, b2), atol=1e-5, rtol=1e-5)

    # Second small check with a batch that is not a multiple of 8 (full-extent block).
    B2 = 37
    x2 = jax.random.normal(kx2, (B2, IN_F), jnp.float32)
    out2 = jax.block_until_ready(mlp_forward(x2, w1, b1, w2, b2))
    assert out2.shape == (B2, 1)
    assert jnp.allclose(out2, _ref(x2, w1, b1, w2, b2), atol=1e-5, rtol=1e-5)

    print("KERNEL_OK")
</pallas_src>

<mosaic_0001>
module attributes {stable_mosaic.version = 11 : i64} {
  func.func @_mlp_kernel(%arg0: i32, %arg1: memref<8x11xf32, #tpu.memory_space<vmem>>, %arg2: memref<11x16xf32, #tpu.memory_space<vmem>>, %arg3: memref<1x16xf32, #tpu.memory_space<vmem>>, %arg4: memref<16x1xf32, #tpu.memory_space<vmem>>, %arg5: memref<1x1xf32, #tpu.memory_space<vmem>>, %arg6: memref<8x1xf32, #tpu.memory_space<vmem>>) attributes {dimension_semantics = [#tpu.dimension_semantics<parallel>], iteration_bounds = array<i64: 1>, scalar_prefetch = 0 : i64, scratch_operands = 0 : i64, tpu.core_type = #tpu.core_type<tc>, window_params = [{transform_indices = @transform_0, window_bounds = array<i64: 8, 11>}, {pipeline_mode = #tpu.pipeline_mode<synchronous>, transform_indices = @transform_1, window_bounds = array<i64: 11, 16>}, {pipeline_mode = #tpu.pipeline_mode<synchronous>, transform_indices = @transform_2, window_bounds = array<i64: 1, 16>}, {pipeline_mode = #tpu.pipeline_mode<synchronous>, transform_indices = @transform_3, window_bounds = array<i64: 16, 1>}, {pipeline_mode = #tpu.pipeline_mode<synchronous>, transform_indices = @transform_4, window_bounds = array<i64: 1, 1>}, {transform_indices = @transform_5, window_bounds = array<i64: 8, 1>}]} {
    %c0 = arith.constant 0 : index
    %c0_0 = arith.constant 0 : index
    %0 = vector.load %arg1[%c0, %c0_0] : memref<8x11xf32, #tpu.memory_space<vmem>>, vector<8x11xf32>
    %c0_1 = arith.constant 0 : index
    %c0_2 = arith.constant 0 : index
    %1 = vector.load %arg2[%c0_1, %c0_2] : memref<11x16xf32, #tpu.memory_space<vmem>>, vector<11x16xf32>
    %cst = arith.constant dense<0.000000e+00> : vector<8x16xf32>
    %2 = tpu.matmul %0, %1, %cst {dimension_numbers = #tpu.dot_dimension_numbers<[1], [0], [0], [1], [0, 0, 1, 1], [], []>} : vector<8x11xf32>, vector<11x16xf32>, vector<8x16xf32> -> vector<8x16xf32>
    %c0_3 = arith.constant 0 : index
    %c0_4 = arith.constant 0 : index
    %3 = vector.load %arg3[%c0_3, %c0_4] : memref<1x16xf32, #tpu.memory_space<vmem>>, vector<1x16xf32>
    %4 = vector.broadcast %3 : vector<1x16xf32> to vector<8x16xf32>
    %5 = arith.addf %2, %4 : vector<8x16xf32>
    %cst_5 = arith.constant 0.000000e+00 : f32
    %6 = vector.broadcast %cst_5 : f32 to vector<8x16xf32>
    %7 = arith.maximumf %5, %6 : vector<8x16xf32>
    %c0_6 = arith.constant 0 : index
    %c0_7 = arith.constant 0 : index
    %8 = vector.load %arg4[%c0_6, %c0_7] : memref<16x1xf32, #tpu.memory_space<vmem>>, vector<16x1xf32>
    %cst_8 = arith.constant dense<0.000000e+00> : vector<8x1xf32>
    %9 = tpu.matmul %7, %8, %cst_8 {dimension_numbers = #tpu.dot_dimension_numbers<[1], [0], [0], [1], [0, 0, 1, 1], [], []>} : vector<8x16xf32>, vector<16x1xf32>, vector<8x1xf32> -> vector<8x1xf32>
    %c0_9 = arith.constant 0 : index
    %c0_10 = arith.constant 0 : index
    %10 = vector.load %arg5[%c0_9, %c0_10] : memref<1x1xf32, #tpu.memory_space<vmem>>, vector<1x1xf32>
    %11 = vector.broadcast %10 : vector<1x1xf32> to vector<8x1xf32>
    %12 = arith.addf %9, %11 : vector<8x1xf32>
    %c0_11 = arith.constant 0 : index
    %c0_12 = arith.constant 0 : index
    %13 = vector.load %arg6[%c0_11, %c0_12] : memref<8x1xf32, #tpu.memory_space<vmem>>, vector<8x1xf32>
    tpu.vector_store %arg6[%c0_11, %c0_12], %12 {strides = array<i32>} : memref<8x1xf32, #tpu.memory_space<vmem>>, vector<8x1xf32>,
    return
  }
  func.func @transform_0(%arg0: i32) -> (i32, i32) {
    %c0_i32 = arith.constant 0 : i32
    %c0_i32_0 = arith.constant 0 : i32
    return %arg0, %c0_i32 : i32, i32
  }
  func.func @transform_1(%arg0: i32) -> (i32, i32) {
    %c0_i32 = arith.constant 0 : i32
    %c0_i32_0 = arith.constant 0 : i32
    %c0_i32_1 = arith.constant 0 : i32
    return %c0_i32, %c0_i32_0 : i32, i32
  }
  func.func @transform_2(%arg0: i32) -> (i32, i32) {
    %c0_i32 = arith.constant 0 : i32
    %c0_i32_0 = arith.constant 0 : i32
    %c0_i32_1 = arith.constant 0 : i32
    return %c0_i32, %c0_i32_0 : i32, i32
  }
  func.func @transform_3(%arg0: i32) -> (i32, i32) {
    %c0_i32 = arith.constant 0 : i32
    %c0_i32_0 = arith.constant 0 : i32
    %c0_i32_1 = arith.constant 0 : i32
    return %c0_i32, %c0_i32_0 : i32, i32
  }
  func.func @transform_4(%arg0: i32) -> (i32, i32) {
    %c0_i32 = arith.constant 0 : i32
    %c0_i32_0 = arith.constant 0 : i32
    %c0_i32_1 = arith.constant 0 : i32
    return %c0_i32, %c0_i32_0 : i32, i32
  }
  func.func @transform_5(%arg0: i32) -> (i32, i32) {
    %c0_i32 = arith.constant 0 : i32
    %c0_i32_0 = arith.constant 0 : i32
    return %arg0, %c0_i32 : i32, i32
  }
}

</mosaic_0001>

<bundles_post_ra>
// kernel: tpu_custom_call.1
= control target key start
LH: loop header
LB: loop body
LE: loop exit
PB: predicated region body
PF: predicated region fallthrough
CT: control target
= control target key end

     0   :  { %vm36_vm0 = vcmask 1042432   ;;  %v236_v0 = vmov 0.0|0.0   ;;  %vm237_vm1 = vmmov 1   ;;  %vm238_vm3 = vmmov 0   ;;  %s294_s1 = inlined_call_operand.vmem [shape: f32[11,16], index: 1, kind: input, shape index: {}]   ;;  %s295_s0 = inlined_call_operand.vmem [shape: f32[8,11], index: 0, kind: input, shape index: {}]   ;;  %s296_s3 = inlined_call_operand.vmem [shape: f32[16,1], index: 3, kind: input, shape index: {}]   ;;  %s297_s4 = inlined_call_operand.<no memory space> [shape: f32[1,1], index: 4, kind: input, shape index: {}]   ;;  %s298_s2 = inlined_call_operand.vmem [shape: f32[1,16], index: 2, kind: input, shape index: {}]   ;;  %s299_s5 = inlined_call_operand.vmem [shape: f32[8,1], index: 5, kind: output, shape index: {}]  }
   0x1   :  { %225 = vmatprep.subr.bf16.mxu0 %v236_v0  ;;  %v23_v1 = vld [vmem:[%s294_s1] sm:$0xff]  ;;  %v24_v2 = vld [vmem:[%s294_s1 + $0x8] sm:$0x7]  ;;  %vm227_vm2 = vmpackc.low %vm36_vm0, %vm237_vm1  ;;  %229 = vmatprep.subr.bf16.mxu1 %v236_v0  ;;  %v239_v4 = vmov 0.0   ;;  %vm32_vm4 = vcmask 89088   ;;  %v10_v9 = vstv %s297_s4  ;;  %vm120_vm5 = vcmask 130048  }
   0x2   :  { %v226_v3 = vpack.c.bf16 %v24_v2, %v23_v1  ;;  %215 = vmatprep.mubr.msk.f32.mxu0 %vm238_vm3, %v239_v4  ;;  %222 = vmatprep.mubr.msk.f32.mxu1 %vm238_vm3, %v239_v4  ;;  %v22_v5 = vld [vmem:[%s295_s0] sm:$0xff]  ;;  %v112_v7 = vld [vmem:[%s296_s3 + $0x8] sm:$0xff]  ;;  %11 = vst [vmem:[#allocation2] sm:$0x1] %v10_v9  ;;  %vm194_vm6 = vcmask 7168  }
   0x3   :  { %v111_v6 = vld [vmem:[%s296_s3] sm:$0xff] }
   0x4   :  { %228 = vmatpush3.bf16.msk.msra.mxu0 %vm227_vm2, %v226_v3  ;;  %v230_v8 = vpack.c.bf16 %v112_v7, %v111_v6  ;;  %v200_v10 = vld [vmem:[%s298_s2] ss:$0 sm:$0xff] }
   0x6   :  { %231 = vmatpush3.bf16.msra.mxu1 %v230_v8 }
   0x7   :  { %216 = vmatmul.mubr.msk.f32.vlgmr.msra.gmra.mrb[0].mxu0 %vm32_vm4, %v22_v5 }
   0x9   :  { %v203_v15 = vld [vmem:[#allocation2] ss:$0 sm:$0xff] }
  0xda   :  { %v106_v11 = vpop.f32.mrb[0].mxu0 }
  0xdb   :  { %v107_v12 = vadd.f32 %v200_v10, %v106_v11  ;;  %v217_v13 = vpop.f32.mrb[1].mxu0 }
  0xdd   :  { %v110_v14 = vmax.f32 %v107_v12, 0.0 }
  0xdf   :  { %223 = vmatmul.mubr.msk.f32.vlgmr.msra.gmra.mrb[0].mxu1 %vm120_vm5, %v110_v14 }
 0x1b2   :  { %v190_v16 = vpop.f32.mrb[0].mxu1 }
 0x1b3   :  { %v191_v17 = vadd.f32 %v203_v15, %v190_v16  ;;  %v224_v18 = vpop.f32.mrb[1].mxu1 }
 0x1b5   :  { %195 = vst.msk [vmem:[%s299_s5] sm:$0xff] %vm194_vm6, %v191_v17 }

</bundles_post_ra>
